<compile_context>
chip_gen: v6e
topology: v6e:2x2x1
jax: 0.10.0
libtpu: 0.0.40
codegen_flags: <defaults>
</compile_context>

<pallas_src>
import functools
import math

import jax
import jax.numpy as jnp
from jax.experimental import pallas as pl
from jax.experimental.pallas import tpu as pltpu


def _round_up(x: int, m: int) -> int:
    return (x + m - 1) // m * m


def ffn_kernel(x_ref, w1_ref, b1_ref, w2_ref, b2_ref, o_ref, acc_ref):
    """One (row-tile, d_ff-chunk) step of out = relu(x@W1+b1) @ W2 + b2."""
    j = pl.program_id(1)

    # Initialize the f32 accumulator with the output bias once per row tile.
    @pl.when(j == 0)
    def _():
        acc_ref[...] = jnp.broadcast_to(
            b2_ref[...].astype(jnp.float32), acc_ref.shape)

    # hidden chunk: relu(x @ W1[:, chunk] + b1[chunk])   (f32 MXU accumulation)
    h = jnp.dot(x_ref[...], w1_ref[...], preferred_element_type=jnp.float32)
    h = jnp.maximum(h + b1_ref[...].astype(jnp.float32), 0.0)

    # accumulate this chunk's contribution through W2[chunk, :]
    acc_ref[...] += jnp.dot(h.astype(w2_ref.dtype), w2_ref[...],
                            preferred_element_type=jnp.float32)

    # store (with bias already folded into acc) on the last reduction step
    @pl.when(j == pl.num_programs(1) - 1)
    def _():
        o_ref[...] = acc_ref[...].astype(o_ref.dtype)


@functools.partial(jax.jit, static_argnames=("tm", "tk"))
def feed_forward_block(x, w1, b1, w2, b2, *, tm=512, tk=512):
    """x: (..., d_model) -> (..., d_model).  W1:(d_model,d_ff), W2:(d_ff,d_model)."""
    *lead, d_model = x.shape
    d_ff = w1.shape[1]
    M = math.prod(lead) if lead else 1
    itemsize = jnp.dtype(x.dtype).itemsize

    x2d = x.reshape(M, d_model)

    # ---- row tiling: multiple of the sublane pack (16 for bf16, else 8) ----
    sub = 16 if x.dtype == jnp.bfloat16 else 8
    tm_eff = _round_up(min(tm, _round_up(M, sub)), sub)
    Mp = _round_up(M, tm_eff)
    if Mp != M:
        x2d = jnp.pad(x2d, ((0, Mp - M), (0, 0)))

    # ---- d_ff (reduction) tiling: full d_ff, or a multiple of 128 lanes ----
    if d_ff <= tk:
        tk_eff, d_ffp = d_ff, d_ff
    else:
        tk_eff = _round_up(min(tk, d_ff), 128)
        d_ffp = _round_up(d_ff, tk_eff)
    if d_ffp != d_ff:
        # Zero padding contributes exactly 0: relu(x@0 + 0) @ 0 == 0.
        w1 = jnp.pad(w1, ((0, 0), (0, d_ffp - d_ff)))
        b1 = jnp.pad(b1, ((0, d_ffp - d_ff),))
        w2 = jnp.pad(w2, ((0, d_ffp - d_ff), (0, 0)))

    b1_2d = b1.reshape(1, d_ffp)
    b2_2d = b2.reshape(1, d_model)

    n_row_tiles = Mp // tm_eff
    n_k_tiles = d_ffp // tk_eff
    grid = (n_row_tiles, n_k_tiles)

    grid_spec = pltpu.PrefetchScalarGridSpec(
        num_scalar_prefetch=0,
        grid=grid,
        in_specs=[
            # x row tile: constant over j -> stays resident across the reduction.
            pl.BlockSpec((tm_eff, d_model), lambda i, j: (i, 0)),
            # Streamed weight / bias chunks (double-buffered by the pipeline).
            pl.BlockSpec((d_model, tk_eff), lambda i, j: (0, j)),   # W1 chunk
            pl.BlockSpec((1, tk_eff), lambda i, j: (0, j)),          # b1 chunk
            pl.BlockSpec((tk_eff, d_model), lambda i, j: (j, 0)),    # W2 chunk
            # b2 is tiny and constant-indexed; residency handles it.
            pl.BlockSpec((1, d_model), lambda i, j: (0, 0)),         # b2
        ],
        out_specs=pl.BlockSpec((tm_eff, d_model), lambda i, j: (i, 0)),
        scratch_shapes=[pltpu.VMEM((tm_eff, d_model), jnp.float32)],
    )

    # Rough VMEM footprint: double-buffered tiles + f32 accumulator.
    vmem_need = (
        2 * (tm_eff * d_model            # x tile
             + d_model * tk_eff          # W1 chunk
             + tk_eff                    # b1 chunk
             + tk_eff * d_model          # W2 chunk
             + d_model                   # b2
             + tm_eff * d_model          # out tile
             ) * itemsize
        + tm_eff * d_model * 4)          # acc scratch
    vmem_limit = min(max(int(vmem_need * 1.5) + (2 << 20), 32 << 20), 96 << 20)

    cost = pl.CostEstimate(
        flops=4 * Mp * d_model * d_ffp,
        transcendentals=0,
        bytes_accessed=(
            2 * Mp * d_model * itemsize
            + n_row_tiles * (2 * d_model * d_ffp + d_ffp + d_model) * itemsize),
    )

    out2d = pl.pallas_call(
        ffn_kernel,
        out_shape=jax.ShapeDtypeStruct((Mp, d_model), x.dtype),
        grid_spec=grid_spec,
        compiler_params=pltpu.CompilerParams(
            dimension_semantics=("parallel", "arbitrary"),
            vmem_limit_bytes=vmem_limit),
        cost_estimate=cost,
    )(x2d, w1, b1_2d, w2, b2_2d)

    if Mp != M:
        out2d = out2d[:M]
    return out2d.reshape(*lead, d_model)


def init_params(key, d_model, d_ff, dtype=jnp.float32):
    """Deterministic init mirroring nn.Linear's default uniform(-1/sqrt(fan_in), ...)."""
    k1, k2, k3, k4 = jax.random.split(key, 4)
    bound1 = 1.0 / (d_model ** 0.5)
    bound2 = 1.0 / (d_ff ** 0.5)
    w1 = jax.random.uniform(k1, (d_model, d_ff), dtype, -bound1, bound1)
    b1 = jax.random.uniform(k2, (d_ff,), dtype, -bound1, bound1)
    w2 = jax.random.uniform(k3, (d_ff, d_model), dtype, -bound2, bound2)
    b2 = jax.random.uniform(k4, (d_model,), dtype, -bound2, bound2)
    return w1, b1, w2, b2


if __name__ == "__main__":
    key = jax.random.PRNGKey(0)
    kx, kp = jax.random.split(key)

    # Small but tiling-exercising shapes: M = 2*60 = 120 rows (padded to 128),
    # lane-dense d_model = 128, d_ff = 384 streamed in 3 chunks of tk=128.
    batch, seq, d_model, d_ff = 2, 60, 128, 384
    x = jax.random.normal(kx, (batch, seq, d_model), jnp.float32)
    w1, b1, w2, b2 = init_params(kp, d_model, d_ff)

    out = feed_forward_block(x, w1, b1, w2, b2, tm=64, tk=128)
    out = jax.block_until_ready(out)

    # Pure-JAX reference (dropout is identity in eval mode).
    ref = jnp.maximum(x.reshape(-1, d_model) @ w1 + b1, 0.0) @ w2 + b2
    ref = ref.reshape(batch, seq, d_model)
    assert out.shape == (batch, seq, d_model)
    assert jnp.allclose(out, ref, atol=1e-3, rtol=1e-3), \
        f"max abs err {jnp.max(jnp.abs(out - ref))}"

    print("KERNEL_OK")
</pallas_src>

<mosaic_0001>
module attributes {stable_mosaic.version = 11 : i64} {
  func.func @ffn_kernel(%arg0: i32, %arg1: i32, %arg2: memref<64x128xf32, #tpu.memory_space<vmem>>, %arg3: memref<128x128xf32, #tpu.memory_space<vmem>>, %arg4: memref<1x128xf32, #tpu.memory_space<vmem>>, %arg5: memref<128x128xf32, #tpu.memory_space<vmem>>, %arg6: memref<1x128xf32, #tpu.memory_space<vmem>>, %arg7: memref<64x128xf32, #tpu.memory_space<vmem>>, %arg8: memref<64x128xf32, #tpu.memory_space<vmem>>) attributes {dimension_semantics = [#tpu.dimension_semantics<parallel>, #tpu.dimension_semantics<arbitrary>], iteration_bounds = array<i64: 2, 3>, scalar_prefetch = 0 : i64, scratch_operands = 1 : i64, tpu.core_type = #tpu.core_type<tc>, window_params = [{transform_indices = @transform_0, window_bounds = array<i64: 64, 128>}, {transform_indices = @transform_1, window_bounds = array<i64: 128, 128>}, {transform_indices = @transform_2, window_bounds = array<i64: 1, 128>}, {transform_indices = @transform_3, window_bounds = array<i64: 128, 128>}, {pipeline_mode = #tpu.pipeline_mode<synchronous>, transform_indices = @transform_4, window_bounds = array<i64: 1, 128>}, {transform_indices = @transform_5, window_bounds = array<i64: 64, 128>}]} {
    %c0_i32 = arith.constant 0 : i32
    %0 = arith.cmpi eq, %arg1, %c0_i32 : i32
    %1 = arith.extui %0 : i1 to i32
    %c0_i32_0 = arith.constant 0 : i32
    %2 = arith.cmpi ne, %1, %c0_i32_0 : i32
    scf.if %2 {
      %c0_15 = arith.constant 0 : index
      %c0_16 = arith.constant 0 : index
      %19 = vector.load %arg6[%c0_15, %c0_16] : memref<1x128xf32, #tpu.memory_space<vmem>>, vector<1x128xf32>
      %20 = vector.shape_cast %19 : vector<1x128xf32> to vector<1x128xf32>
      %21 = vector.broadcast %20 : vector<1x128xf32> to vector<64x128xf32>
      %c0_17 = arith.constant 0 : index
      %c0_18 = arith.constant 0 : index
      %22 = vector.load %arg8[%c0_17, %c0_18] : memref<64x128xf32, #tpu.memory_space<vmem>>, vector<64x128xf32>
      tpu.vector_store %arg8[%c0_17, %c0_18], %21 {strides = array<i32>} : memref<64x128xf32, #tpu.memory_space<vmem>>, vector<64x128xf32>,
    } else {
    }
    %c0 = arith.constant 0 : index
    %c0_1 = arith.constant 0 : index
    %3 = vector.load %arg2[%c0, %c0_1] : memref<64x128xf32, #tpu.memory_space<vmem>>, vector<64x128xf32>
    %c0_2 = arith.constant 0 : index
    %c0_3 = arith.constant 0 : index
    %4 = vector.load %arg3[%c0_2, %c0_3] : memref<128x128xf32, #tpu.memory_space<vmem>>, vector<128x128xf32>
    %cst = arith.constant dense<0.000000e+00> : vector<64x128xf32>
    %5 = tpu.matmul %3, %4, %cst {dimension_numbers = #tpu.dot_dimension_numbers<[1], [0], [0], [1], [0, 0, 1, 1], [], []>} : vector<64x128xf32>, vector<128x128xf32>, vector<64x128xf32> -> vector<64x128xf32>
    %c0_4 = arith.constant 0 : index
    %c0_5 = arith.constant 0 : index
    %6 = vector.load %arg4[%c0_4, %c0_5] : memref<1x128xf32, #tpu.memory_space<vmem>>, vector<1x128xf32>
    %7 = vector.broadcast %6 : vector<1x128xf32> to vector<64x128xf32>
    %8 = arith.addf %5, %7 : vector<64x128xf32>
    %cst_6 = arith.constant 0.000000e+00 : f32
    %9 = vector.broadcast %cst_6 : f32 to vector<64x128xf32>
    %10 = arith.maximumf %8, %9 : vector<64x128xf32>
    %c0_7 = arith.constant 0 : index
    %c0_8 = arith.constant 0 : index
    %11 = vector.load %arg8[%c0_7, %c0_8] : memref<64x128xf32, #tpu.memory_space<vmem>>, vector<64x128xf32>
    %c0_9 = arith.constant 0 : index
    %c0_10 = arith.constant 0 : index
    %12 = vector.load %arg5[%c0_9, %c0_10] : memref<128x128xf32, #tpu.memory_space<vmem>>, vector<128x128xf32>
    %cst_11 = arith.constant dense<0.000000e+00> : vector<64x128xf32>
    %13 = tpu.matmul %10, %12, %cst_11 {dimension_numbers = #tpu.dot_dimension_numbers<[1], [0], [0], [1], [0, 0, 1, 1], [], []>} : vector<64x128xf32>, vector<128x128xf32>, vector<64x128xf32> -> vector<64x128xf32>
    %14 = arith.addf %11, %13 : vector<64x128xf32>
    %c0_12 = arith.constant 0 : index
    %c0_13 = arith.constant 0 : index
    %15 = vector.load %arg8[%c0_12, %c0_13] : memref<64x128xf32, #tpu.memory_space<vmem>>, vector<64x128xf32>
    tpu.vector_store %arg8[%c0_12, %c0_13], %14 {strides = array<i32>} : memref<64x128xf32, #tpu.memory_space<vmem>>, vector<64x128xf32>,
    %c2_i32 = arith.constant 2 : i32
    %16 = arith.cmpi eq, %arg1, %c2_i32 : i32
    %17 = arith.extui %16 : i1 to i32
    %c0_i32_14 = arith.constant 0 : i32
    %18 = arith.cmpi ne, %17, %c0_i32_14 : i32
    scf.if %18 {
      %c0_15 = arith.constant 0 : index
      %c0_16 = arith.constant 0 : index
      %19 = vector.load %arg8[%c0_15, %c0_16] : memref<64x128xf32, #tpu.memory_space<vmem>>, vector<64x128xf32>
      %c0_17 = arith.constant 0 : index
      %c0_18 = arith.constant 0 : index
      %20 = vector.load %arg7[%c0_17, %c0_18] : memref<64x128xf32, #tpu.memory_space<vmem>>, vector<64x128xf32>
      tpu.vector_store %arg7[%c0_17, %c0_18], %19 {strides = array<i32>} : memref<64x128xf32, #tpu.memory_space<vmem>>, vector<64x128xf32>,
    } else {
    }
    return
  }
  func.func @transform_0(%arg0: i32, %arg1: i32) -> (i32, i32) {
    %c0_i32 = arith.constant 0 : i32
    %c0_i32_0 = arith.constant 0 : i32
    return %arg0, %c0_i32 : i32, i32
  }
  func.func @transform_1(%arg0: i32, %arg1: i32) -> (i32, i32) {
    %c0_i32 = arith.constant 0 : i32
    %c0_i32_0 = arith.constant 0 : i32
    return %c0_i32, %arg1 : i32, i32
  }
  func.func @transform_2(%arg0: i32, %arg1: i32) -> (i32, i32) {
    %c0_i32 = arith.constant 0 : i32
    %c0_i32_0 = arith.constant 0 : i32
    return %c0_i32, %arg1 : i32, i32
  }
  func.func @transform_3(%arg0: i32, %arg1: i32) -> (i32, i32) {
    %c0_i32 = arith.constant 0 : i32
    %c0_i32_0 = arith.constant 0 : i32
    return %arg1, %c0_i32 : i32, i32
  }
  func.func @transform_4(%arg0: i32, %arg1: i32) -> (i32, i32) {
    %c0_i32 = arith.constant 0 : i32
    %c0_i32_0 = arith.constant 0 : i32
    %c0_i32_1 = arith.constant 0 : i32
    return %c0_i32, %c0_i32_0 : i32, i32
  }
  func.func @transform_5(%arg0: i32, %arg1: i32) -> (i32, i32) {
    %c0_i32 = arith.constant 0 : i32
    %c0_i32_0 = arith.constant 0 : i32
    return %arg0, %c0_i32 : i32, i32
  }
}

</mosaic_0001>

<bundles_post_ra>
// kernel: feed_forward_block.1
= control target key start
LH: loop header
LB: loop body
LE: loop exit
PB: predicated region body
PF: predicated region fallthrough
CT: control target
= control target key end

     0   :  { %10 = vsyncpa [#allocation5], 0  ;;  %s1421_s0 = inlined_call_operand.vmem [shape: f32[128,128], index: 0, kind: input, shape index: {}]   ;;  %s1422_s1 = inlined_call_operand.vmem [shape: f32[128,384], index: 1, kind: input, shape index: {}]   ;;  %s1423_s2 = inlined_call_operand.vmem [shape: f32[1,384], index: 2, kind: input, shape index: {}]   ;;  %s1424_s3 = inlined_call_operand.hbm [shape: f32[384,128], index: 3, kind: input, shape index: {}]   ;;  %s1425_s4 = inlined_call_operand.vmem [shape: f32[1,128], index: 4, kind: input, shape index: {}]   ;;  %s1426_s5 = inlined_call_operand.vmem [shape: f32[128,128], index: 5, kind: output, shape index: {}]  }
   0x1   :  { %12 = vsyncpa [#allocation5 + $0x1], 0  ;;  %s1210_s18 = smov 0   ;;  %s1212_s19 = smov 0  }
   0x2   :  { %s1214_s20 = smov 0   ;;  %s1216_s21 = smov 0  }
   0x3   :  { %s1218_s22 = smov 0   ;;  %s1220_s23 = smov 0  }
   0x4   :  { %s1222_s24 = smov 0   ;;  %s1224_s25 = smov 0  }
   0x5 LB: > { %s856_s26 = sadd.s32 4294967295, %s1175_s25   ;;  %s27_s27 = sadd.s32 1, %s1167_s23  ;;  %s1175_s25 = sphi %s1224_s25, %s18_s25   ;;  %s1171_s24 = sphi %s1222_s24, %s1435_s24   ;;  %s1167_s23 = sphi %s1220_s23, %s1434_s23   ;;  %s1163_s22 = sphi %s1218_s22, %s1433_s22   ;;  %s1159_s21 = sphi %s1216_s21, %s1432_s21   ;;  %s1155_s20 = sphi %s1214_s20, %s1431_s20   ;;  %s1151_s19 = sphi %s1212_s19, %s1430_s19   ;;  %s1147_s18 = sphi %s1210_s18, %s1429_s18  }
   0x6   : > { %p28_p0 = scmp.ge.s32.totalorder %s27_s27, 3  ;;  %s30_s28 = sadd.s32 1, %s1171_s24 }
   0x7   : > { %s63_s29 = sadd.s32 1, %s1155_s20  ;;  %p70_p1 = scmp.ne.s32.totalorder %s1155_s20, %s1151_s19 }
   0x8   : > { %s1437_s27 = smov (%p28_p0, %s27_s27), 0  ;;  %s1439_s28 = smov (!%p28_p0, %s30_s28), %s1171_s24 }
   0x9   : > { %s60_s30 = ssub.s32 %s1167_s23, %s1437_s27  ;;  %p71_p2 = scmp.eq.s32.totalorder %s1175_s25, 0 }
   0xa   : > { %p32_p3 = scmp.ge.s32.totalorder %s1439_s28, 2  ;;  %p61_p4 = scmp.eq.s32.totalorder %s60_s30, 0 }
   0xb   : > { %p1260_p5 = por %p71_p2, %p70_p1  ;;  %p128_p6 = scmp.ne.s32.totalorder %s1151_s19, %s1147_s18 }
   0xc   : > { %s1441_s28 = smov (%p32_p3, %s1439_s28), 0  ;;  %p129_p7 = scmp.eq.s32.totalorder %s856_s26, 0 }
   0xd   : > { %s1268_s7 = scalar_select %p61_p4, %s1155_s20, %s63_s29  }
   0xe   : > { %p1270_p8 = por %p129_p7, %p128_p6  ;;  %p859_p9 = scmp.ge.s32.totalorder %s1175_s25, 6 }
  0x10   : > { %198 = sbr.rel (%p859_p9) target bundleno = 49 (0x31), region = 20 }
  0x15   : > { %210 = sbr.rel (!%p1260_p5) target bundleno = 33 (0x21), region = 28  ;;  %s212_s9 = sand.u32 (%p1260_p5), 1, %s1155_s20  }
  0x16   : > { %s861_s10 = sshll.u32 (%p1260_p5), %s1167_s23, 3  ;;  %s860_s11 = sshll.u32 (%p1260_p5), %s212_s9, 7 }
  0x17   : > { %s1282_s14 = scalar_lea.vmem (%p1260_p5), %s1422_s1, %s861_s10  ;;  %s214_s15 = scalar_lea.vmem (%p1260_p5), [#allocation3], %s860_s11 }
  0x18   : > { %v275_v0 = vld [vmem:[%s1282_s14] sm:$0xff] (%p1260_p5)  ;;  %v277_v1 = vld [vmem:[%s1282_s14 + $0x18] sm:$0xff] (%p1260_p5)  ;;  %v279_v2 = vld [vmem:[%s1282_s14 + $0x30] sm:$0xff] (%p1260_p5) }
  0x19   : > { %276 = vst [vmem:[%s214_s15] sm:$0xff] (%p1260_p5), %v275_v0  ;;  %278 = vst [vmem:[%s214_s15 + $0x8] sm:$0xff] (%p1260_p5), %v277_v1  ;;  %v281_v3 = vld [vmem:[%s1282_s14 + $0x48] sm:$0xff] (%p1260_p5)  ;;  %v283_v4 = vld [vmem:[%s1282_s14 + $0x60] sm:$0xff] (%p1260_p5) }
  0x1a   : > { %280 = vst [vmem:[%s214_s15 + $0x10] sm:$0xff] %v279_v2  ;;  %v285_v5 = vld [vmem:[%s1282_s14 + $0x78] sm:$0xff]  ;;  %282 = vst [vmem:[%s214_s15 + $0x18] sm:$0xff] %v281_v3  ;;  %v287_v6 = vld [vmem:[%s1282_s14 + $0x90] sm:$0xff] }
  0x1b   : > { %284 = vst [vmem:[%s214_s15 + $0x20] sm:$0xff] %v283_v4  ;;  %286 = vst [vmem:[%s214_s15 + $0x28] sm:$0xff] %v285_v5  ;;  %v289_v7 = vld [vmem:[%s1282_s14 + $0xa8] sm:$0xff]  ;;  %v291_v8 = vld [vmem:[%s1282_s14 + $0xc0] sm:$0xff] }
  0x1c   : > { %288 = vst [vmem:[%s214_s15 + $0x30] sm:$0xff] %v287_v6  ;;  %290 = vst [vmem:[%s214_s15 + $0x38] sm:$0xff] %v289_v7  ;;  %v293_v9 = vld [vmem:[%s1282_s14 + $0xd8] sm:$0xff]  ;;  %v295_v10 = vld [vmem:[%s1282_s14 + $0xf0] sm:$0xff] }
  0x1d   : > { %292 = vst [vmem:[%s214_s15 + $0x40] sm:$0xff] %v291_v8  ;;  %v297_v11 = vld [vmem:[%s1282_s14 + $0x108] sm:$0xff]  ;;  %294 = vst [vmem:[%s214_s15 + $0x48] sm:$0xff] %v293_v9  ;;  %v299_v12 = vld [vmem:[%s1282_s14 + $0x120] sm:$0xff] }
  0x1e   : > { %296 = vst [vmem:[%s214_s15 + $0x50] sm:$0xff] %v295_v10  ;;  %298 = vst [vmem:[%s214_s15 + $0x58] sm:$0xff] %v297_v11  ;;  %v301_v13 = vld [vmem:[%s1282_s14 + $0x138] sm:$0xff]  ;;  %v303_v14 = vld [vmem:[%s1282_s14 + $0x150] sm:$0xff] }
  0x1f   : > { %300 = vst [vmem:[%s214_s15 + $0x60] sm:$0xff] %v299_v12  ;;  %302 = vst [vmem:[%s214_s15 + $0x68] sm:$0xff] %v301_v13  ;;  %v305_v15 = vld [vmem:[%s1282_s14 + $0x168] sm:$0xff] }
  0x20   : > { %304 = vst [vmem:[%s214_s15 + $0x70] sm:$0xff] %v303_v14  ;;  %306 = vst [vmem:[%s214_s15 + $0x78] sm:$0xff] %v305_v15 }
  0x21 PF: > { %s319_s16 = sand.u32 1, %s1155_s20   ;;  %s878_s17 = sshll.u32 %s1167_s23, 11 }
  0x22   : > { %s862_s18 = sshll.u32 %s319_s16, 7  ;;  %s329_s30 = scalar_lea.hbm %s1424_s3, %s878_s17 }
  0x23   : > { %s323_s9 = scalar_lea.vmem [#allocation4], %s862_s18  ;;  %s320_s11 = scalar_lea.sflag [#allocation5], %s319_s16 }
  0x24   : > { %s330_s10 = sshll.u32 %s323_s9, 4  ;;  %s1177_s13 = smov [#allocation4]   ;;  %s331_s10 = int_to_ptr.vmem [resolvable:$true] %s330_s10 }
  0x25   : > { %s1095_s12 = scalar_lea.vmem %s331_s10, 2048  ;;  %s1099_s14 = sshll.u32 %s1177_s13, 4  ;;  %s1100_s14 = int_to_ptr.vmem [resolvable:$false] %s1099_s14 }
  0x26   : > { %p1096_p10 = scmp.ne.s32.totalorder %s331_s10, %s1095_s12  ;;  %s1101_s15 = scalar_lea.vmem %s1100_s14, 4096 }
  0x27   : > { %p1102_p13 = scmp.lt.s32.totalorder %s331_s10, %s1100_s14  ;;  %p1103_p0 = scmp.lt.s32.totalorder %s1101_s15, %s1095_s12 }
  0x28   : > { %p1097_p11 = pnand %p1096_p10, %p1260_p5 }
  0x29   : > { %p1104_p1 = por %p1103_p0, %p1102_p13 }
  0x2a   : > { %p1098_p12 = pneg %p1097_p11 }
  0x2c   : > { %p1105_p2 = pnand %p1104_p1, %p1098_p12 }
  0x2e   : > { %1108 = shalt.err (!%p1105_p2)
}
  0x2f   : > { %s1178_s26 = smov 128   ;;  %s1179_s17 = smov 8  }
  0x30   : > { %1015 = dma.hbm_to_vmem [thread:$0]  (%p1260_p5), %s329_s30, 2048, %s331_s10, %s320_s11, %s1178_s26, %s1178_s26, %s1179_s17  }
  0x31 PF: > { %p865_p3 = scmp.ge.s32.totalorder %s1175_s25, 1  ;;  %p338_p4 = scmp.lt.s32.totalorder %s1175_s25, 7 }
  0x33   : > { %p339_p6 = pnand %p865_p3, %p338_p4 }
  0x34   : > { %s345_s16 = sand.u32 (!%p339_p6), 1, %s1151_s19  }
  0x35   : > { %342 = sbr.rel (%p339_p6) target bundleno = 523 (0x20b), region = 74  ;;  %s866_s18 = sshll.u32 (!%p339_p6), %s345_s16, 7 }
  0x36   : > { %s1312_s29 = scalar_lea.vmem (!%p339_p6), [#allocation3], %s866_s18  ;;  %s352_s9 = scalar_lea.sflag (!%p339_p6), [#allocation5], %s345_s16 }
  0x37   : > { %s1314_s12 = scalar_lea.vmem (!%p339_p6), [#allocation4], %s866_s18 }
  0x3a   : > { %1142 = dma.done.wait (%p1270_p8), %s352_s9, 2048  }
  0x3b   : > { %1144 = vsyncadd (%p1270_p8), %s352_s9, 4294965248  ;;  %s868_s6 = sshll.u32 %s1163_s22, 3  ;;  %p400_p5 = scmp.lt.s32.totalorder %s1159_s21, 2 }
  0x3c   : > { %p395_p7 = scmp.lt.s32.totalorder %s868_s6, 15  ;;  %p872_p8 = scmp.ne.s32.totalorder %s1159_s21, 0 }
  0x3d   : > { %s1323_s30 = scalar_select %p400_p5, %s1159_s21, 2 }
  0x3e   : > { %s1443_s6 = smov (!%p395_p7, %s868_s6), 15  ;;  %413 = sbr.rel (%p872_p8) target bundleno = 72 (0x48), region = 86 }
  0x3f   : > { %s402_s13 = scalar_lea.vmem %s1423_s2, %s1323_s30  ;;  %s869_s14 = sshll.u32 %s1443_s6, 3 }
  0x40   : > { %s1332_s8 = scalar_lea.vmem %s1421_s0, %s869_s14  ;;  %s1337_s22 = scalar_lea.vmem %s1426_s5, %s869_s14 }
  0x43   : > { %v873_v16 = vld [vmem:[%s1425_s4] ss:$0 sm:$0xff] }
  0x44   : > { %421 = vst [vmem:[#allocation2 + $0x30] sm:$0xff] %v873_v16  ;;  %422 = vst [vmem:[#allocation2] sm:$0xff] %v873_v16 }
  0x45   : > { %423 = vst [vmem:[#allocation2 + $0x18] sm:$0xff] %v873_v16  ;;  %424 = vst [vmem:[#allocation2 + $0x10] sm:$0xff] %v873_v16 }
  0x46   : > { %425 = vst [vmem:[#allocation2 + $0x8] sm:$0xff] %v873_v16  ;;  %426 = vst [vmem:[#allocation2 + $0x20] sm:$0xff] %v873_v16 }
  0x47   : > { %427 = vst [vmem:[#allocation2 + $0x28] sm:$0xff] %v873_v16  ;;  %428 = vst [vmem:[#allocation2 + $0x38] sm:$0xff] %v873_v16 }
  0x48 PF: > { %v452_v17 = vld [vmem:[%s1312_s29 + $0x78] sm:$0xff]  ;;  %v451_v18 = vld [vmem:[%s1312_s29 + $0x70] sm:$0xff]  ;;  %v450_v19 = vld [vmem:[%s1312_s29 + $0x68] sm:$0xff]  ;;  %p875_p9 = scmp.ne.s32.totalorder %s1159_s21, 2 }
  0x49   : > { %927 = vmatprep.subr.mxu0 %v452_v17  ;;  %v449_v20 = vld [vmem:[%s1312_s29 + $0x60] sm:$0xff]  ;;  %v448_v22 = vld [vmem:[%s1312_s29 + $0x58] sm:$0xff]  ;;  %v447_v23 = vld [vmem:[%s1312_s29 + $0x50] sm:$0xff] }
  0x4a   : > { %928 = vmatpush3.msra.mxu0 %v452_v17  ;;  %v429_v21 = vld [vmem:[%s1332_s8] sm:$0xff]  ;;  %v596_v24 = vld [vmem:[%s1314_s12 + $0x78] sm:$0xff]  ;;  %v595_v25 = vld [vmem:[%s1314_s12 + $0x70] sm:$0xff] }
  0x4b   : > { %929 = vmatprep.subr.mxu0 %v451_v18  ;;  %959 = vmatprep.mubr.f32.mxu0 %v429_v21  ;;  %v446_v26 = vld [vmem:[%s1312_s29 + $0x48] sm:$0xff]  ;;  %v445_v28 = vld [vmem:[%s1312_s29 + $0x40] sm:$0xff]  ;;  %v444_v30 = vld [vmem:[%s1312_s29 + $0x38] sm:$0xff] }
  0x4c   : > { %930 = vmatpush3.msra.mxu0 %v451_v18  ;;  %971 = vmatprep.subr.mxu1 %v596_v24  ;;  %v594_v27 = vld [vmem:[%s1314_s12 + $0x68] sm:$0xff]  ;;  %v593_v29 = vld [vmem:[%s1314_s12 + $0x60] sm:$0xff]  ;;  %v592_v31 = vld [vmem:[%s1314_s12 + $0x58] sm:$0xff] }
  0x4d   : > { %931 = vmatprep.subr.mxu0 %v450_v19  ;;  %972 = vmatpush3.msra.mxu1 %v596_v24  ;;  %v443_v32 = vld [vmem:[%s1312_s29 + $0x30] sm:$0xff]  ;;  %v442_v34 = vld [vmem:[%s1312_s29 + $0x28] sm:$0xff]  ;;  %v441_v36 = vld [vmem:[%s1312_s29 + $0x20] sm:$0xff] }
  0x4e   : > { %932 = vmatpush3.msra.mxu0 %v450_v19  ;;  %973 = vmatprep.subr.mxu1 %v595_v25  ;;  %v591_v33 = vld [vmem:[%s1314_s12 + $0x50] sm:$0xff]  ;;  %v590_v35 = vld [vmem:[%s1314_s12 + $0x48] sm:$0xff]  ;;  %v589_v37 = vld [vmem:[%s1314_s12 + $0x40] sm:$0xff] }
  0x4f   : > { %933 = vmatprep.subr.mxu0 %v449_v20  ;;  %974 = vmatpush3.msra.mxu1 %v595_v25  ;;  %v440_v38 = vld [vmem:[%s1312_s29 + $0x18] sm:$0xff]  ;;  %v439_v40 = vld [vmem:[%s1312_s29 + $0x10] sm:$0xff]  ;;  %v438_v42 = vld [vmem:[%s1312_s29 + $0x8] sm:$0xff] }
  0x50   : > { %934 = vmatpush3.msra.mxu0 %v449_v20  ;;  %975 = vmatprep.subr.mxu1 %v594_v27  ;;  %v588_v39 = vld [vmem:[%s1314_s12 + $0x38] sm:$0xff]  ;;  %v587_v41 = vld [vmem:[%s1314_s12 + $0x30] sm:$0xff]  ;;  %v586_v43 = vld [vmem:[%s1314_s12 + $0x28] sm:$0xff] }
  0x51   : > { %935 = vmatprep.subr.mxu0 %v448_v22  ;;  %976 = vmatpush3.msra.mxu1 %v594_v27  ;;  %v437_v44 = vld [vmem:[%s1312_s29] sm:$0xff]  ;;  %v430_v46 = vld [vmem:[%s1332_s8 + $0x8] sm:$0xff]  ;;  %v431_v47 = vld [vmem:[%s1332_s8 + $0x10] sm:$0xff] }
  0x52   : > { %936 = vmatpush3.msra.mxu0 %v448_v22  ;;  %977 = vmatprep.subr.mxu1 %v593_v29  ;;  %v585_v45 = vld [vmem:[%s1314_s12 + $0x20] sm:$0xff]  ;;  %v432_v48 = vld [vmem:[%s1332_s8 + $0x18] sm:$0xff]  ;;  %v434_v50 = vld [vmem:[%s1332_s8 + $0x28] sm:$0xff] }
  0x53   : > { %937 = vmatprep.subr.mxu0 %v447_v23  ;;  %978 = vmatpush3.msra.mxu1 %v593_v29  ;;  %v433_v49 = vld [vmem:[%s1332_s8 + $0x20] sm:$0xff]  ;;  %v435_v51 = vld [vmem:[%s1332_s8 + $0x30] sm:$0xff]  ;;  %v436_v52 = vld [vmem:[%s1332_s8 + $0x38] sm:$0xff] }
  0x54   : > { %938 = vmatpush3.msra.mxu0 %v447_v23  ;;  %979 = vmatprep.subr.mxu1 %v592_v31  ;;  %v584_v53 = vld [vmem:[%s1314_s12 + $0x18] sm:$0xff]  ;;  %v583_v54 = vld [vmem:[%s1314_s12 + $0x10] sm:$0xff]  ;;  %v582_v55 = vld [vmem:[%s1314_s12 + $0x8] sm:$0xff] }
  0x55   : > { %939 = vmatprep.subr.mxu0 %v446_v26  ;;  %980 = vmatpush3.msra.mxu1 %v592_v31  ;;  %v581_v56 = vld [vmem:[%s1314_s12] sm:$0xff]  ;;  %v573_v20 = vld [vmem:[#allocation2 + $0x30] sm:$0xff] }
  0x56   : > { %940 = vmatpush3.msra.mxu0 %v446_v26  ;;  %981 = vmatprep.subr.mxu1 %v591_v33  ;;  %v874_v57 = vld [vmem:[%s402_s13] ss:$0 sm:$0xff]  ;;  %v576_v23 = vld [vmem:[#allocation2 + $0x10] sm:$0xff]  ;;  %v575_v26 = vld [vmem:[#allocation2 + $0x18] sm:$0xff] }
  0x57   : > { %941 = vmatprep.subr.mxu0 %v445_v28  ;;  %982 = vmatpush3.msra.mxu1 %v591_v33  ;;  %v574_v18 = vld [vmem:[#allocation2] sm:$0xff] }
  0x58   : > { %942 = vmatpush3.msra.mxu0 %v445_v28  ;;  %983 = vmatprep.subr.mxu1 %v590_v35  ;;  %v578_v29 = vld [vmem:[#allocation2 + $0x20] sm:$0xff] }
  0x59   : > { %943 = vmatprep.subr.mxu0 %v444_v30  ;;  %984 = vmatpush3.msra.mxu1 %v590_v35  ;;  %v580_v35 = vld [vmem:[#allocation2 + $0x38] sm:$0xff] }
  0x5a   : > { %944 = vmatpush3.msra.mxu0 %v444_v30  ;;  %985 = vmatprep.subr.mxu1 %v589_v37 }
  0x5b   : > { %945 = vmatprep.subr.mxu0 %v443_v32  ;;  %986 = vmatpush3.msra.mxu1 %v589_v37 }
  0x5c   : > { %946 = vmatpush3.msra.mxu0 %v443_v32  ;;  %987 = vmatprep.subr.mxu1 %v588_v39  ;;  %v577_v32 = vld [vmem:[#allocation2 + $0x8] sm:$0xff] }
  0x5d   : > { %947 = vmatprep.subr.mxu0 %v442_v34  ;;  %988 = vmatpush3.msra.mxu1 %v588_v39 }
  0x5e   : > { %948 = vmatpush3.msra.mxu0 %v442_v34  ;;  %989 = vmatprep.subr.mxu1 %v587_v41 }
  0x5f   : > { %949 = vmatprep.subr.mxu0 %v441_v36  ;;  %990 = vmatpush3.msra.mxu1 %v587_v41 }
  0x60   : > { %950 = vmatpush3.msra.mxu0 %v441_v36  ;;  %991 = vmatprep.subr.mxu1 %v586_v43 }
  0x61   : > { %951 = vmatprep.subr.mxu0 %v440_v38  ;;  %992 = vmatpush3.msra.mxu1 %v586_v43 }
  0x62   : > { %952 = vmatpush3.msra.mxu0 %v440_v38  ;;  %993 = vmatprep.subr.mxu1 %v585_v45  ;;  %v579_v38 = vld [vmem:[#allocation2 + $0x28] sm:$0xff] }
  0x63   : > { %953 = vmatprep.subr.mxu0 %v439_v40  ;;  %994 = vmatpush3.msra.mxu1 %v585_v45 }
  0x64   : > { %954 = vmatpush3.msra.mxu0 %v439_v40  ;;  %995 = vmatprep.subr.mxu1 %v584_v53 }
  0x65   : > { %955 = vmatprep.subr.mxu0 %v438_v42  ;;  %996 = vmatpush3.msra.mxu1 %v584_v53 }
  0x66   : > { %956 = vmatpush3.msra.mxu0 %v438_v42  ;;  %997 = vmatprep.subr.mxu1 %v583_v54 }
  0x67   : > { %957 = vmatprep.subr.mxu0 %v437_v44  ;;  %998 = vmatpush3.msra.mxu1 %v583_v54 }
  0x68   : > { %958 = vmatpush3.msra.mxu0 %v437_v44  ;;  %999 = vmatprep.subr.mxu1 %v582_v55 }
  0x69   : > { %960 = vmatmul.mubr.f32.vlgmr.msra.gmra.mxu0 %v430_v46  ;;  %1000 = vmatpush3.msra.mxu1 %v582_v55 }
  0x6a   : > { %962 = vmatprep.mubr.f32.mxu0 %v431_v47  ;;  %1001 = vmatprep.subr.mxu1 %v581_v56 }
  0x6b   : > { %1002 = vmatpush3.msra.mxu1 %v581_v56 }
  0x6d   : > { %963 = vmatmul.mubr.f32.gmra.mxu0 %v432_v48 }
  0x6e   : > { %965 = vmatprep.mubr.f32.mxu0 %v433_v49 }
  0x71   : > { %966 = vmatmul.mubr.f32.gmra.mxu0 %v434_v50 }
  0x72   : > { %968 = vmatprep.mubr.f32.mxu0 %v435_v51 }
  0x75   : > { %969 = vmatmul.mubr.f32.gmra.mxu0 %v436_v52 }
 0x129   : > { %v961_v58 = vpop.f32.mrf.mxu0 }
 0x12a   : > { %v532_v59 = vadd.f32 %v961_v58, %v874_v57 }
 0x12b   : > { %v526_v60 = vpop.f32.mrf.mxu0 }
 0x12c   : > { %v527_v61 = vadd.f32 %v874_v57, %v526_v60  ;;  %v566_v0 = vmax.f32 %v532_v59, 0.0 }
 0x12d   : > { %v964_v62 = vpop.f32.mrf.mxu0 }
 0x12e   : > { %v565_v63 = vmax.f32 %v527_v61, 0.0  ;;  %v542_v1 = vadd.f32 %v964_v62, %v874_v57 }
 0x12f   : > { %v536_v2 = vpop.f32.mrf.mxu0 }
 0x130   : > { %v537_v3 = vadd.f32 %v874_v57, %v536_v2  ;;  %1003 = vmatprep.mubr.f32.mxu1 %v565_v63  ;;  %v568_v6 = vmax.f32 %v542_v1, 0.0 }
 0x131   : > { %v967_v4 = vpop.f32.mrf.mxu0  ;;  %1004 = vmatmul.mubr.f32.vlgmr.msra.gmra.mxu1 %v566_v0 }
 0x132   : > { %v567_v5 = vmax.f32 %v537_v3, 0.0  ;;  %v552_v7 = vadd.f32 %v967_v4, %v874_v57 }
 0x133   : > { %v546_v8 = vpop.f32.mrf.mxu0 }
 0x134   : > { %v547_v9 = vadd.f32 %v874_v57, %v546_v8  ;;  %1006 = vmatprep.mubr.f32.mxu1 %v567_v5  ;;  %v570_v12 = vmax.f32 %v552_v7, 0.0 }
 0x135   : > { %v970_v10 = vpop.f32.mrf.mxu0  ;;  %1007 = vmatmul.mubr.f32.gmra.mxu1 %v568_v6 }
 0x136   : > { %v569_v11 = vmax.f32 %v547_v9, 0.0  ;;  %v562_v13 = vadd.f32 %v970_v10, %v874_v57 }
 0x137   : > { %v556_v14 = vpop.f32.mrf.mxu0 }
 0x138   : > { %v557_v15 = vadd.f32 %v874_v57, %v556_v14  ;;  %1009 = vmatprep.mubr.f32.mxu1 %v569_v11  ;;  %v572_v17 = vmax.f32 %v562_v13, 0.0 }
 0x139   : > { %1010 = vmatmul.mubr.f32.gmra.mxu1 %v570_v12 }
 0x13a   : > { %v571_v16 = vmax.f32 %v557_v15, 0.0 }
 0x13c   : > { %1012 = vmatprep.mubr.f32.mxu1 %v571_v16 }
 0x13d   : > { %1013 = vmatmul.mubr.f32.gmra.mxu1 %v572_v17 }
 0x1f1   : > { %v1005_v19 = vpop.f32.mrf.mxu1 }
 0x1f2   : > { %v703_v21 = vadd.f32 %v1005_v19, %v574_v18 }
 0x1f3   : > { %v663_v22 = vpop.f32.mrf.mxu1 }
 0x1f4   : > { %711 = vst [vmem:[#allocation2] sm:$0xff] %v703_v21  ;;  %v702_v24 = vadd.f32 %v663_v22, %v573_v20 }
 0x1f5   : > { %v1008_v25 = vpop.f32.mrf.mxu1 }
 0x1f6   : > { %710 = vst [vmem:[#allocation2 + $0x30] sm:$0xff] %v702_v24  ;;  %v705_v27 = vadd.f32 %v1008_v25, %v576_v23 }
 0x1f7   : > { %v673_v28 = vpop.f32.mrf.mxu1 }
 0x1f8   : > { %713 = vst [vmem:[#allocation2 + $0x10] sm:$0xff] %v705_v27  ;;  %v704_v30 = vadd.f32 %v673_v28, %v575_v26 }
 0x1f9   : > { %v1011_v31 = vpop.f32.mrf.mxu1 }
 0x1fa   : > { %712 = vst [vmem:[#allocation2 + $0x18] sm:$0xff] %v704_v30  ;;  %v707_v33 = vadd.f32 %v1011_v31, %v578_v29 }
 0x1fb   : > { %v683_v34 = vpop.f32.mrf.mxu1 }
 0x1fc   : > { %715 = vst [vmem:[#allocation2 + $0x20] sm:$0xff] %v707_v33  ;;  %v706_v36 = vadd.f32 %v683_v34, %v577_v32 }
 0x1fd   : > { %v1014_v37 = vpop.f32.mrf.mxu1 }
 0x1fe   : > { %714 = vst [vmem:[#allocation2 + $0x8] sm:$0xff] %v706_v36  ;;  %v709_v39 = vadd.f32 %v1014_v37, %v580_v35  ;;  %721 = sbr.rel (%p875_p9) target bundleno = 523 (0x20b), region = 90 }
 0x1ff   : > { %v693_v40 = vpop.f32.mrf.mxu1 }
 0x200   : > { %717 = vst [vmem:[#allocation2 + $0x38] sm:$0xff] %v709_v39  ;;  %v708_v41 = vadd.f32 %v693_v40, %v579_v38 }
 0x202   : > { %716 = vst [vmem:[#allocation2 + $0x28] sm:$0xff] %v708_v41 }
 0x203   : > { %v722_v42 = vld [vmem:[#allocation2 + $0x30] sm:$0xff]  ;;  %v723_v43 = vld [vmem:[#allocation2] sm:$0xff]  ;;  %v724_v44 = vld [vmem:[#allocation2 + $0x18] sm:$0xff] }
 0x204   : > { %730 = vst [vmem:[%s1337_s22] sm:$0xff] %v722_v42  ;;  %731 = vst [vmem:[%s1337_s22 + $0x8] sm:$0xff] %v723_v43  ;;  %v725_v45 = vld [vmem:[#allocation2 + $0x10] sm:$0xff]  ;;  %v727_v47 = vld [vmem:[#allocation2 + $0x20] sm:$0xff] }
 0x205   : > { %732 = vst [vmem:[%s1337_s22 + $0x10] sm:$0xff] %v724_v44  ;;  %v726_v46 = vld [vmem:[#allocation2 + $0x8] sm:$0xff]  ;;  %733 = vst [vmem:[%s1337_s22 + $0x18] sm:$0xff] %v725_v45 }
 0x206   : > { %734 = vst [vmem:[%s1337_s22 + $0x20] sm:$0xff] %v726_v46  ;;  %735 = vst [vmem:[%s1337_s22 + $0x28] sm:$0xff] %v727_v47 }
 0x207   : > { %v729_v49 = vld [vmem:[#allocation2 + $0x38] sm:$0xff] }
 0x208   : > { %737 = vst [vmem:[%s1337_s22 + $0x38] sm:$0xff] %v729_v49 }
 0x209   : > { %v728_v48 = vld [vmem:[#allocation2 + $0x28] sm:$0xff] }
 0x20a   : > { %736 = vst [vmem:[%s1337_s22 + $0x30] sm:$0xff] %v728_v48 }
 0x20b PF: > { %s18_s25 = sadd.s32 1, %s1175_s25   ;;  %s1429_s18 = smov %s1151_s19 }
 0x20c   : > { %p15_p10 = scmp.ge.s32.totalorder %s18_s25, 8   ;;  %s1430_s19 = smov %s1155_s20 }
 0x20d   : > { %s1431_s20 = smov %s1268_s7  ;;  %s1432_s21 = smov %s1167_s23 }
 0x20e   : > { %s1433_s22 = smov %s1171_s24  ;;  %s1434_s23 = smov %s1437_s27 }
 0x20f   : > { %s1435_s24 = smov %s1441_s28  ;;  %17 = sbr.rel (!%p15_p10) target bundleno = 5 (0x5), region = 140 }
 0x214   :  { %760 = vsyncpa [#allocation5], 1 }
 0x215   :  { %762 = vsyncpa [#allocation5 + $0x1], 1 }

</bundles_post_ra>
